<compile_context>
chip_gen: v7x
topology: tpu7x:2x2x1
jax: 0.10.0
libtpu: 0.0.40
codegen_flags: <defaults>
</compile_context>

<pallas_src>
import functools

import jax
import jax.numpy as jnp
from jax.experimental import pallas as pl
from jax.experimental.pallas import tpu as pltpu


def _round_up(x, m):
    return ((x + m - 1) // m) * m


def _sage_gcn_kernel(neigh_ref, self_ref, w_ref, out_ref, *, inv_count, out_channels):
    # neigh_ref: (S, T, C), self_ref: (T, C), w_ref: (C, F), out_ref: (T, 2F)
    S = neigh_ref.shape[0]
    F = out_channels

    # (S+1)-way mean: accumulate in f32 with S unrolled VPU adds on dense (T, C) slabs.
    acc = self_ref[...].astype(jnp.float32)
    for s in range(S):
        acc = acc + neigh_ref[s].astype(jnp.float32)
    agg = acc * inv_count                                            # (T, C)

    # Project on the MXU with f32 accumulation.
    y = jnp.dot(agg, w_ref[...].astype(jnp.float32),
                preferred_element_type=jnp.float32).astype(out_ref.dtype)  # (T, F)

    # concat=True -> duplicate projection; two direct stores, no concat temp.
    out_ref[:, :F] = y
    out_ref[:, F:] = y


def sage_gcn_layer(neighbor_feats, self_feats, weight, *, num_sample, tile_n=256):
    """neighbor_feats: (N, S, C), self_feats: (N, C), weight: (C, F) -> (N, 2F)."""
    N, S, C = neighbor_feats.shape
    assert S == num_sample
    assert self_feats.shape == (N, C)
    F = weight.shape[1]

    # Layout fix: (N, S, C) -> (S, N, C) so kernel vregs are dense (tile_n, C) slabs.
    neigh_t = jnp.transpose(neighbor_feats, (1, 0, 2))

    # Node tile: multiple of 8 (sublane constraint), capped by the requested tile size.
    tile_n = max(8, min(_round_up(tile_n, 8), _round_up(N, 8)))
    grid = (pl.cdiv(N, tile_n),)

    kernel = functools.partial(
        _sage_gcn_kernel, inv_count=1.0 / (num_sample + 1.0), out_channels=F)

    cost = pl.CostEstimate(
        flops=2 * N * C * F,
        transcendentals=0,
        bytes_accessed=4 * (N * S * C + N * C + C * F + N * 2 * F),
    )

    return pl.pallas_call(
        kernel,
        out_shape=jax.ShapeDtypeStruct((N, 2 * F), jnp.float32),
        grid_spec=pl.GridSpec(
            grid=grid,
            in_specs=[
                pl.BlockSpec((S, tile_n, C), lambda i: (0, i, 0)),   # neighbors (S, N, C)
                pl.BlockSpec((tile_n, C), lambda i: (i, 0)),         # self feats
                pl.BlockSpec((C, F), lambda i: (0, 0)),              # weight (resident)
            ],
            out_specs=pl.BlockSpec((tile_n, 2 * F), lambda i: (i, 0)),
        ),
        compiler_params=pltpu.CompilerParams(
            dimension_semantics=("parallel",),
        ),
        cost_estimate=cost,
    )(neigh_t, self_feats, weight)


def glorot(key, shape):
    # torch_geometric-style glorot: uniform(-a, a), a = sqrt(6 / (fan_in + fan_out))
    a = jnp.sqrt(6.0 / (shape[0] + shape[1]))
    return jax.random.uniform(key, shape, dtype=jnp.float32, minval=-a, maxval=a)


if __name__ == "__main__":
    key = jax.random.PRNGKey(0)
    k_neigh, k_self, k_w, k_sw = jax.random.split(key, 4)

    N = 64           # number of nodes
    num_sample = 4   # sampled neighbors per node
    in_channels = 16
    out_channels = 32

    neighbor_feats = jax.random.normal(
        k_neigh, (N, num_sample, in_channels), dtype=jnp.float32)
    self_feats = jax.random.normal(k_self, (N, in_channels), dtype=jnp.float32)

    # Deterministic parameter init matching SAGELayer.__init__ / reset_parameters.
    weight = glorot(k_w, (in_channels, out_channels))
    # self_weight exists on the module but is unused by SAGEGCNLayer.forward (GCN aggregator).
    self_weight = glorot(k_sw, (in_channels, out_channels))  # noqa: F841

    # tile_n=16 -> 4 pipelined grid steps at this small demo size.
    out = sage_gcn_layer(neighbor_feats, self_feats, weight,
                         num_sample=num_sample, tile_n=16)
    out = jax.block_until_ready(out)

    # Reference check in plain JAX.
    agg_ref = jnp.mean(
        jnp.concatenate([neighbor_feats, self_feats[:, None, :]], axis=-2), axis=-2)
    proj_ref = agg_ref @ weight
    ref = jnp.concatenate([proj_ref, proj_ref], axis=-1)
    assert out.shape == (N, 2 * out_channels)
    assert jnp.allclose(out, ref, atol=1e-5, rtol=1e-5)

    print("KERNEL_OK")
</pallas_src>

<mosaic_0001>
module attributes {stable_mosaic.version = 11 : i64} {
  func.func @_sage_gcn_kernel(%arg0: i32, %arg1: memref<4x16x16xf32, #tpu.memory_space<vmem>>, %arg2: memref<16x16xf32, #tpu.memory_space<vmem>>, %arg3: memref<16x32xf32, #tpu.memory_space<vmem>>, %arg4: memref<16x64xf32, #tpu.memory_space<vmem>>) attributes {dimension_semantics = [#tpu.dimension_semantics<parallel>], iteration_bounds = array<i64: 4>, scalar_prefetch = 0 : i64, scratch_operands = 0 : i64, tpu.core_type = #tpu.core_type<tc>, window_params = [{transform_indices = @transform_0, window_bounds = array<i64: 4, 16, 16>}, {transform_indices = @transform_1, window_bounds = array<i64: 16, 16>}, {pipeline_mode = #tpu.pipeline_mode<synchronous>, transform_indices = @transform_2, window_bounds = array<i64: 16, 32>}, {transform_indices = @transform_3, window_bounds = array<i64: 16, 64>}]} {
    %c0 = arith.constant 0 : index
    %c0_0 = arith.constant 0 : index
    %0 = vector.load %arg2[%c0, %c0_0] : memref<16x16xf32, #tpu.memory_space<vmem>>, vector<16x16xf32>
    %c0_1 = arith.constant 0 : index
    %c0_2 = arith.constant 0 : index
    %c0_3 = arith.constant 0 : index
    %1 = vector.load %arg1[%c0_1, %c0_2, %c0_3] : memref<4x16x16xf32, #tpu.memory_space<vmem>>, vector<1x16x16xf32>
    %2 = vector.shape_cast %1 : vector<1x16x16xf32> to vector<16x16xf32>
    %3 = arith.addf %0, %2 : vector<16x16xf32>
    %c1 = arith.constant 1 : index
    %c0_4 = arith.constant 0 : index
    %c0_5 = arith.constant 0 : index
    %4 = vector.load %arg1[%c1, %c0_4, %c0_5] : memref<4x16x16xf32, #tpu.memory_space<vmem>>, vector<1x16x16xf32>
    %5 = vector.shape_cast %4 : vector<1x16x16xf32> to vector<16x16xf32>
    %6 = arith.addf %3, %5 : vector<16x16xf32>
    %c2 = arith.constant 2 : index
    %c0_6 = arith.constant 0 : index
    %c0_7 = arith.constant 0 : index
    %7 = vector.load %arg1[%c2, %c0_6, %c0_7] : memref<4x16x16xf32, #tpu.memory_space<vmem>>, vector<1x16x16xf32>
    %8 = vector.shape_cast %7 : vector<1x16x16xf32> to vector<16x16xf32>
    %9 = arith.addf %6, %8 : vector<16x16xf32>
    %c3 = arith.constant 3 : index
    %c0_8 = arith.constant 0 : index
    %c0_9 = arith.constant 0 : index
    %10 = vector.load %arg1[%c3, %c0_8, %c0_9] : memref<4x16x16xf32, #tpu.memory_space<vmem>>, vector<1x16x16xf32>
    %11 = vector.shape_cast %10 : vector<1x16x16xf32> to vector<16x16xf32>
    %12 = arith.addf %9, %11 : vector<16x16xf32>
    %cst = arith.constant 2.000000e-01 : f32
    %13 = vector.broadcast %cst : f32 to vector<16x16xf32>
    %14 = arith.mulf %12, %13 : vector<16x16xf32>
    %c0_10 = arith.constant 0 : index
    %c0_11 = arith.constant 0 : index
    %15 = vector.load %arg3[%c0_10, %c0_11] : memref<16x32xf32, #tpu.memory_space<vmem>>, vector<16x32xf32>
    %cst_12 = arith.constant dense<0.000000e+00> : vector<16x32xf32>
    %16 = tpu.matmul %14, %15, %cst_12 {dimension_numbers = #tpu.dot_dimension_numbers<[1], [0], [0], [1], [0, 0, 1, 1], [], []>} : vector<16x16xf32>, vector<16x32xf32>, vector<16x32xf32> -> vector<16x32xf32>
    %c0_13 = arith.constant 0 : index
    %c0_14 = arith.constant 0 : index
    %17 = vector.load %arg4[%c0_13, %c0_14] : memref<16x64xf32, #tpu.memory_space<vmem>>, vector<16x32xf32>
    tpu.vector_store %arg4[%c0_13, %c0_14], %16 {strides = array<i32>} : memref<16x64xf32, #tpu.memory_space<vmem>>, vector<16x32xf32>,
    %c0_15 = arith.constant 0 : index
    %c32 = arith.constant 32 : index
    %18 = vector.load %arg4[%c0_15, %c32] : memref<16x64xf32, #tpu.memory_space<vmem>>, vector<16x32xf32>
    tpu.vector_store %arg4[%c0_15, %c32], %16 {strides = array<i32>} : memref<16x64xf32, #tpu.memory_space<vmem>>, vector<16x32xf32>,
    return
  }
  func.func @transform_0(%arg0: i32) -> (i32, i32, i32) {
    %c0_i32 = arith.constant 0 : i32
    %c0_i32_0 = arith.constant 0 : i32
    %c0_i32_1 = arith.constant 0 : i32
    return %c0_i32, %arg0, %c0_i32_0 : i32, i32, i32
  }
  func.func @transform_1(%arg0: i32) -> (i32, i32) {
    %c0_i32 = arith.constant 0 : i32
    %c0_i32_0 = arith.constant 0 : i32
    return %arg0, %c0_i32 : i32, i32
  }
  func.func @transform_2(%arg0: i32) -> (i32, i32) {
    %c0_i32 = arith.constant 0 : i32
    %c0_i32_0 = arith.constant 0 : i32
    %c0_i32_1 = arith.constant 0 : i32
    return %c0_i32, %c0_i32_0 : i32, i32
  }
  func.func @transform_3(%arg0: i32) -> (i32, i32) {
    %c0_i32 = arith.constant 0 : i32
    %c0_i32_0 = arith.constant 0 : i32
    return %arg0, %c0_i32 : i32, i32
  }
}

</mosaic_0001>

<bundles_post_ra>
// kernel: tpu_custom_call.1
= control target key start
LH: loop header
LB: loop body
LE: loop exit
PB: predicated region body
PF: predicated region fallthrough
CT: control target
= control target key end

     0   :  { %8 = vsyncpa [#allocation4], 0  ;;  %s761_s0 = inlined_call_operand.vmem [shape: f32[4,64,16], index: 0, kind: input, shape index: {}]   ;;  %s762_s1 = inlined_call_operand.vmem [shape: f32[64,16], index: 1, kind: input, shape index: {}]   ;;  %s763_s2 = inlined_call_operand.vmem [shape: f32[16,32], index: 2, kind: input, shape index: {}]   ;;  %s764_s3 = inlined_call_operand.hbm [shape: f32[64,64], index: 3, kind: output, shape index: {}]  }
   0x1   :  { %10 = vsyncpa [#allocation4 + $0x1], 0  ;;  %s642_s12 = smov 0   ;;  %s644_s13 = smov 0  }
   0x2   :  { %s646_s14 = smov 0   ;;  %s648_s15 = smov 0  }
   0x3 LB: > { %s663_s16 = sadd.s32 4294967295, %s616_s15   ;;  %s471_s17 = sadd.s32 4294967294, %s616_s15   ;;  %s616_s15 = sphi %s648_s15, %s770_s15   ;;  %s612_s14 = sphi %s646_s14, %s769_s14   ;;  %s608_s13 = sphi %s644_s13, %s768_s13   ;;  %s604_s12 = sphi %s642_s12, %s767_s12  }
   0x4   : > { %s667_s18 = sadd.s32 1, %s616_s15   ;;  %s23_s19 = sadd.s32 1, %s612_s14 }
   0x5   : > { %s20_s20 = ssub.s32 %s616_s15, %s667_s18  ;;  %p30_p0 = scmp.ne.s32.totalorder %s612_s14, %s608_s13 }
   0x6   : > { %p21_p1 = scmp.eq.s32.totalorder %s20_s20, 0  ;;  %p31_p2 = scmp.eq.s32.totalorder %s616_s15, 0 }
   0x7   : > { %p107_p3 = scmp.eq.s32.totalorder %s663_s16, 3  ;;  %p112_p4 = scmp.ne.s32.totalorder %s608_s13, %s604_s12 }
   0x8   : > { %s679_s21 = scalar_select %p21_p1, %s612_s14, %s23_s19  }
   0x9   : > { %p32_p5 = por %p31_p2, %p30_p0  ;;  %p681_p6 = por %p107_p3, %p30_p0 }
   0xa   : > { %p113_p7 = scmp.eq.s32.totalorder %s471_s17, 3  ;;  %p473_p9 = scmp.ge.s32.totalorder %s616_s15, 4 }
   0xc   : > { %p685_p8 = por %p113_p7, %p112_p4  ;;  %132 = sbr.rel (%p473_p9) target bundleno = 27 (0x1b), region = 20 }
  0x13   : > { %135 = sbr.rel (!%p32_p5) target bundleno = 27 (0x1b), region = 24  ;;  %s137_s24 = sand.u32 (%p32_p5), 1, %s612_s14  }
  0x14   : > { %s495_s25 = sshll.u32 (%p32_p5), %s616_s15, 4  ;;  %s474_s26 = sshll.u32 (%p32_p5), %s137_s24, 6 }
  0x15   : > { %s142_s29 = scalar_lea.vmem (%p32_p5), %s761_s0, %s495_s25  ;;  %s139_s30 = scalar_lea.vmem (%p32_p5), [#allocation2], %s474_s26 }
  0x16   : > { %v184_v0 = vld [vmem:[%s142_s29] sm:$0xff] (%p32_p5)  ;;  %v186_v1 = vld [vmem:[%s142_s29 + $0x8] sm:$0xff] (%p32_p5) }
  0x17   : > { %v188_v2 = vld [vmem:[%s142_s29 + $0x40] sm:$0xff] (%p32_p5)  ;;  %185 = vst [vmem:[%s139_s30] sm:$0xff] (%p32_p5), %v184_v0  ;;  %187 = vst [vmem:[%s139_s30 + $0x8] sm:$0xff] (%p32_p5), %v186_v1  ;;  %v190_v3 = vld [vmem:[%s142_s29 + $0x48] sm:$0xff] (%p32_p5) }
  0x18   : > { %189 = vst [vmem:[%s139_s30 + $0x10] sm:$0xff] (%p32_p5), %v188_v2  ;;  %v192_v4 = vld [vmem:[%s142_s29 + $0x80] sm:$0xff] (%p32_p5)  ;;  %v194_v5 = vld [vmem:[%s142_s29 + $0x88] sm:$0xff] (%p32_p5)  ;;  %191 = vst [vmem:[%s139_s30 + $0x18] sm:$0xff] (%p32_p5), %v190_v3 }
  0x19   : > { %193 = vst [vmem:[%s139_s30 + $0x20] sm:$0xff] (%p32_p5), %v192_v4  ;;  %195 = vst [vmem:[%s139_s30 + $0x28] sm:$0xff] (%p32_p5), %v194_v5  ;;  %v196_v6 = vld [vmem:[%s142_s29 + $0xc0] sm:$0xff] (%p32_p5)  ;;  %v198_v7 = vld [vmem:[%s142_s29 + $0xc8] sm:$0xff] (%p32_p5) }
  0x1a   : > { %197 = vst [vmem:[%s139_s30 + $0x30] sm:$0xff] %v196_v6  ;;  %199 = vst [vmem:[%s139_s30 + $0x38] sm:$0xff] %v198_v7 }
  0x1b PF: > { %p477_p10 = scmp.ge.s32.totalorder %s616_s15, 1  ;;  %p213_p11 = scmp.lt.s32.totalorder %s616_s15, 5 }
  0x1d   : > { %p214_p12 = pnand %p477_p10, %p213_p11 }
  0x1e   : > { %v279_v8 = vld [vmem:[%s763_s2] sm:$0xff] (!%p214_p12)  ;;  %v280_v9 = vld [vmem:[%s763_s2 + $0x8] sm:$0xff] (!%p214_p12)  ;;  %s704_s8 = sand.u32 (!%p214_p12), 1, %s608_s13   ;;  %s480_s9 = sshll.u32 (!%p214_p12), %s663_s16, 1  ;;  %vm281_vm0 = vcmask (!%p214_p12), 130048   ;;  %vm363_vm1 = vcmask (!%p214_p12), 261120  }
  0x1f   : > { %217 = sbr.rel (%p214_p12) target bundleno = 400 (0x190), region = 66  ;;  %v508_v10 = vpack.c.bf16 (!%p214_p12), %v280_v9, %v279_v8  ;;  %s478_s10 = sshll.u32 (!%p214_p12), %s704_s8, 6  ;;  %vm374_vm2 = vcmask (!%p214_p12), 523520  }
  0x20   : > { %p250_p13 = scmp.lt.s32.totalorder (!%p214_p12), %s480_s9, 7  ;;  %s222_s17 = scalar_lea.vmem (!%p214_p12), [#allocation2], %s478_s10 }
  0x21   : > { %509 = vmatprep.subr.bf16.mxu0 (!%p214_p12), %v508_v10  ;;  %v258_v11 = vld [vmem:[%s222_s17] sm:$0xff] (!%p214_p12)  ;;  %v259_v12 = vld [vmem:[%s222_s17 + $0x8] sm:$0xff] (!%p214_p12)  ;;  %v482_v13 = vld [vmem:[%s222_s17 + $0x10] sm:$0xff] (!%p214_p12)  ;;  %s479_s25 = sshll.u32 (!%p214_p12), %s704_s8, 4  ;;  %s618_s27 = smov (!%p214_p12), 32  }
  0x22   : > { %511 = vmatpush3.bf16.msra.mxu0 (!%p214_p12), %v508_v10  ;;  %v483_v16 = vld [vmem:[%s222_s17 + $0x18] sm:$0xff] (!%p214_p12)  ;;  %v484_v19 = vld [vmem:[%s222_s17 + $0x20] sm:$0xff] (!%p214_p12)  ;;  %v485_v20 = vld [vmem:[%s222_s17 + $0x28] sm:$0xff] (!%p214_p12)  ;;  %s247_s26 = scalar_lea.vmem (!%p214_p12), [#allocation3], %s479_s25  ;;  %s496_s28 = sshll.u32 (!%p214_p12), %s663_s16, 8 }
  0x23   : > { %v486_v23 = vld [vmem:[%s222_s17 + $0x30] sm:$0xff] (!%p214_p12)  ;;  %v487_v24 = vld [vmem:[%s222_s17 + $0x38] sm:$0xff] (!%p214_p12)  ;;  %s391_s29 = sshll.u32 (!%p214_p12), %s247_s26, 4  ;;  %s716_s5 = scalar_lea.hbm (!%p214_p12), %s764_s3, %s496_s28  ;;  %s718_s29 = int_to_ptr.vmem [resolvable:$true] %s391_s29 }
  0x24   : > { %s378_s6 = scalar_lea.sflag (!%p214_p12), [#allocation4], %s704_s8  ;;  %s554_s7 = scalar_lea.vmem (!%p214_p12), %s718_s29, 256 }
  0x25   : > { %p555_p0 = scmp.ne.s32.totalorder (!%p214_p12), %s718_s29, %s554_s7  ;;  %s619_s16 = smov (!%p214_p12), [#allocation3]  }
  0x26   : > { %s772_s9 = smov (!%p250_p13, %s480_s9), 7 }
  0x27   : > { %s481_s11 = sshll.u32 %s772_s9, 3  ;;  %p556_p1 = pnand %p555_p0, %p681_p6 }
  0x28   : > { %s253_s24 = scalar_lea.vmem %s762_s1, %s481_s11  ;;  %s558_s9 = sshll.u32 %s619_s16, 4  ;;  %s559_s9 = int_to_ptr.vmem [resolvable:$false] %s558_s9 }
  0x29   : > { %v256_v14 = vld [vmem:[%s253_s24] sm:$0xff]  ;;  %v257_v15 = vld [vmem:[%s253_s24 + $0x8] sm:$0xff]  ;;  %p557_p2 = pneg %p556_p1  ;;  %s560_s10 = scalar_lea.vmem %s559_s9, 512 }
  0x2a   : > { %v260_v17 = vadd.f32 %v258_v11, %v256_v14  ;;  %v261_v18 = vadd.f32 %v259_v12, %v257_v15  ;;  %p561_p3 = scmp.lt.s32.totalorder %s718_s29, %s559_s9  ;;  %p562_p4 = scmp.lt.s32.totalorder %s560_s10, %s554_s7 }
  0x2c   : > { %v265_v21 = vadd.f32 %v482_v13, %v260_v17  ;;  %v266_v22 = vadd.f32 %v483_v16, %v261_v18  ;;  %p563_p5 = por %p562_p4, %p561_p3 }
  0x2e   : > { %v270_v25 = vadd.f32 %v484_v19, %v265_v21  ;;  %v271_v26 = vadd.f32 %v485_v20, %v266_v22  ;;  %p564_p7 = pnand %p563_p5, %p557_p2 }
  0x30   : > { %v275_v27 = vadd.f32 %v486_v23, %v270_v25  ;;  %v276_v28 = vadd.f32 %v487_v24, %v271_v26 }
  0x32   : > { %v277_v29 = vmul.f32 0.2, %v275_v27  ;;  %v278_v30 = vmul.f32 0.2, %v276_v28 }
  0x34   : > { %505 = vmatprep.mubr.msk.f32.mxu0 %vm281_vm0, %v277_v29 }
  0x35   : > { %506 = vmatmul.mubr.msk.f32.vlgmr.msra.gmra.mrb[0].mxu0 %vm281_vm0, %v278_v30 }
 0x108   : > { %v507_v31 = vpop.f32.mrb[0].mxu0 }
 0x109   : > { %365 = vst.msk [vmem:[%s247_s26 + $0x8] sm:$0xff] %vm363_vm1, %v507_v31  ;;  %v354_v32 = vpop.f32.mrb[1].mxu0 }
 0x10a   : > { %364 = vst.msk [vmem:[%s247_s26] sm:$0xff] %vm363_vm1, %v354_v32  ;;  %368 = vrot.lane.b32.xlu0 %v354_v32, %s618_s27 }
 0x10e   : > { %370 = vrot.lane.b32.xlu0 %v507_v31, %s618_s27 }
 0x17c   : > { %v369_v33 = vpop.permute.xlu0 %368 }
 0x17d   : > { %375 = vst.msk [vmem:[%s247_s26] sm:$0xff] %vm374_vm2, %v369_v33 }
 0x180   : > { %v371_v34 = vpop.permute.xlu0 %370 }
 0x181   : > { %376 = vst.msk [vmem:[%s247_s26 + $0x8] sm:$0xff] %vm374_vm2, %v371_v34 }
 0x182   : > { %567 = shalt.err (!%p564_p7)
}
 0x183   : > { %s568_s11 = scalar_lea.hbm %s716_s5, 256  ;;  %s572_s20 = scalar_lea.hbm %s764_s3, 1024 }
 0x184   : > { %p569_p9 = scmp.ne.s32.totalorder %s716_s5, %s568_s11  ;;  %p573_p12 = scmp.lt.u32.totalorder %s716_s5, %s764_s3 }
 0x185   : > { %p574_p13 = scmp.lt.u32.totalorder %s572_s20, %s568_s11  ;;  %p576_p1 = scmp.lt.u32.totalorder %s568_s11, %s716_s5 }
 0x186   : > { %p570_p10 = pnand %p569_p9, %p681_p6 }
 0x187   : > { %p575_p0 = por %p574_p13, %p573_p12 }
 0x188   : > { %p571_p11 = pneg %p570_p10 }
 0x189   : > { %p577_p2 = por %p576_p1, %p575_p0 }
 0x18b   : > { %p578_p3 = pnand %p577_p2, %p571_p11 }
 0x18d   : > { %581 = shalt.err (!%p578_p3)
}
 0x18e   : > { %s620_s26 = smov 128   ;;  %s621_s27 = smov 8  }
 0x18f   : > { %512 = dma.vmem_to_hbm [thread:$0]  (%p681_p6), %s718_s29, 256, %s716_s5, %s378_s6, %s620_s26, %s620_s26, %s621_s27  }
 0x190 PF: > { %p518_p4 = scmp.ge.s32.totalorder %s616_s15, 2  ;;  %s406_s28 = sand.u32 1, %s604_s12  }
 0x191   : > { %s407_s30 = scalar_lea.sflag [#allocation4], %s406_s28 }
 0x192   : > { %p515_p5 = pnand %p518_p4, %p685_p8 }
 0x194   : > { %599 = dma.done.wait (!%p515_p5), %s407_s30, 256  }
 0x195   : > { %601 = vsyncadd (!%p515_p5), %s407_s30, 4294967040  ;;  %p13_p7 = scmp.ge.s32.totalorder %s667_s18, 6   ;;  %s767_s12 = smov %s608_s13 }
 0x196   : > { %s768_s13 = smov %s612_s14  ;;  %s769_s14 = smov %s679_s21 }
 0x197   : > { %s770_s15 = smov %s667_s18  ;;  %15 = sbr.rel (!%p13_p7) target bundleno = 3 (0x3), region = 116 }
 0x19e   :  { %412 = vsyncpa [#allocation4], 1 }
 0x19f   :  { %414 = vsyncpa [#allocation4 + $0x1], 1 }

</bundles_post_ra>
